<compile_context>
chip_gen: v7x
topology: tpu7x:2x2x1
jax: 0.10.0
libtpu: 0.0.40
codegen_flags: <defaults>
</compile_context>

<pallas_src>
import functools

import jax
import jax.numpy as jnp
from jax.experimental import pallas as pl
from jax.experimental.pallas import tpu as pltpu

LN_EPS = 1e-5
LANE = 128


def _round_up(a, b):
    return ((a + b - 1) // b) * b


def _layernorm_padded(h, gamma, beta, n_real):
    """LayerNorm over a lane-padded feature axis.

    `h` is (TM, Hp) f32 whose columns >= n_real are exactly zero; gamma/beta
    are zero-padded.  Mean / E[x^2] are taken as sums over all Hp columns
    divided by the real feature count, which is exact because padded columns
    contribute 0 to both sums.
    """
    inv_n = 1.0 / float(n_real)
    mu = jnp.sum(h, axis=-1, keepdims=True) * inv_n
    ex2 = jnp.sum(h * h, axis=-1, keepdims=True) * inv_n
    var = ex2 - mu * mu
    return (h - mu) * jax.lax.rsqrt(var + LN_EPS) * gamma + beta


def generic_mlp_kernel(x_ref,
                       w1_ref, g1_ref, b1_ref,
                       w2_ref, g2_ref, b2_ref,
                       w3_ref, b3_ref,
                       o_ref,
                       *, h1_real, h2_real):
    """Fused Linear->LayerNorm->ReLU (x2) -> Linear(+bias) on one row tile."""
    x = x_ref[...]                                               # (TM, Dp_in) bf16

    # hidden layer 1: Linear (no bias) -> LayerNorm -> ReLU
    h = jnp.dot(x, w1_ref[...], preferred_element_type=jnp.float32)
    h = _layernorm_padded(h, g1_ref[...], b1_ref[...], h1_real)
    h = jnp.maximum(h, 0.0)

    # hidden layer 2: Linear (no bias) -> LayerNorm -> ReLU
    h = jnp.dot(h.astype(jnp.bfloat16), w2_ref[...],
                preferred_element_type=jnp.float32)
    h = _layernorm_padded(h, g2_ref[...], b2_ref[...], h2_real)
    h = jnp.maximum(h, 0.0)

    # output layer: Linear with bias (no norm, no activation)
    out = jnp.dot(h.astype(jnp.bfloat16), w3_ref[...],
                  preferred_element_type=jnp.float32)
    out = out + b3_ref[...]
    o_ref[...] = out.astype(o_ref.dtype)


def _pad2(a, rows, cols):
    return jnp.pad(a, ((0, rows - a.shape[0]), (0, cols - a.shape[1])))


def generic_mlp_pallas(x, params, *, tile_m=512):
    """x: (B, S, D_in) float32.  params: dict of f32 weights (see init_params)."""
    B, S, D_in = x.shape
    M = B * S

    w1, g1, b1 = params["w1"], params["g1"], params["b1"]
    w2, g2, b2 = params["w2"], params["g2"], params["b2"]
    w3, b3 = params["w3"], params["b3"]
    H1, H2, D_out = w1.shape[1], w2.shape[1], w3.shape[1]

    # Lane-align every channel dim (zero pad); sublane-align / tile the rows.
    Dp_in, Hp1, Hp2, Dp_out = (_round_up(d, LANE) for d in (D_in, H1, H2, D_out))
    tile_m = min(tile_m, _round_up(M, 8))        # don't over-pad tiny inputs
    M_pad = _round_up(M, tile_m)
    grid = (M_pad // tile_m,)

    # Rows padded with zeros (harmless through LN: var=0 -> rsqrt(eps) finite),
    # matmul operands cast to bf16, weights zero-padded to lane multiples.
    x2d = _pad2(x.reshape(M, D_in), M_pad, Dp_in).astype(jnp.bfloat16)
    w1p = _pad2(w1, Dp_in, Hp1).astype(jnp.bfloat16)
    w2p = _pad2(w2, Hp1, Hp2).astype(jnp.bfloat16)
    w3p = _pad2(w3, Hp2, Dp_out).astype(jnp.bfloat16)
    g1p = _pad2(g1, 1, Hp1).astype(jnp.float32)
    b1p = _pad2(b1, 1, Hp1).astype(jnp.float32)
    g2p = _pad2(g2, 1, Hp2).astype(jnp.float32)
    b2p = _pad2(b2, 1, Hp2).astype(jnp.float32)
    b3p = _pad2(b3, 1, Dp_out).astype(jnp.float32)

    full = lambda i: (0, 0)   # parameters stay resident (constant block index)

    cost = pl.CostEstimate(
        flops=2 * M * (D_in * H1 + H1 * H2 + H2 * D_out),
        transcendentals=2 * M,                          # one rsqrt per row per LN
        bytes_accessed=(x2d.size * 2 + M_pad * Dp_out * 4
                        + (w1p.size + w2p.size + w3p.size) * 2
                        + (g1p.size + b1p.size + g2p.size + b2p.size + b3p.size) * 4),
    )

    kernel = functools.partial(generic_mlp_kernel, h1_real=H1, h2_real=H2)

    out2d = pl.pallas_call(
        kernel,
        out_shape=jax.ShapeDtypeStruct((M_pad, Dp_out), jnp.float32),
        grid_spec=pltpu.PrefetchScalarGridSpec(
            num_scalar_prefetch=0,
            grid=grid,
            in_specs=[
                pl.BlockSpec((tile_m, Dp_in), lambda i: (i, 0)),   # x row tile
                pl.BlockSpec((Dp_in, Hp1), full),                  # W1 (in, out)
                pl.BlockSpec((1, Hp1), full),                      # LN1 gamma
                pl.BlockSpec((1, Hp1), full),                      # LN1 beta
                pl.BlockSpec((Hp1, Hp2), full),                    # W2
                pl.BlockSpec((1, Hp2), full),                      # LN2 gamma
                pl.BlockSpec((1, Hp2), full),                      # LN2 beta
                pl.BlockSpec((Hp2, Dp_out), full),                 # W3
                pl.BlockSpec((1, Dp_out), full),                   # b3
            ],
            out_specs=pl.BlockSpec((tile_m, Dp_out), lambda i: (i, 0)),
        ),
        compiler_params=pltpu.CompilerParams(
            dimension_semantics=("parallel",)),
        cost_estimate=cost,
    )(x2d, w1p, g1p, b1p, w2p, g2p, b2p, w3p, b3p)

    return out2d[:M, :D_out].reshape(B, S, D_out)


def generic_mlp_reference(x, params):
    """Plain-JAX reference mirroring the PyTorch GenericMLP forward.

    Matmul operands are cast to bf16 (f32 accumulation) to mirror the kernel's
    numerics; LayerNorm uses the standard E[(x-mu)^2] formulation.
    """
    B, S, D_in = x.shape
    bf = jnp.bfloat16

    def ln(h, gamma, beta):
        mu = jnp.mean(h, axis=-1, keepdims=True)
        var = jnp.mean((h - mu) ** 2, axis=-1, keepdims=True)
        return (h - mu) * jax.lax.rsqrt(var + LN_EPS) * gamma + beta

    h = x.reshape(B * S, D_in)
    h = jnp.dot(h.astype(bf), params["w1"].astype(bf),
                preferred_element_type=jnp.float32)
    h = jnp.maximum(ln(h, params["g1"], params["b1"]), 0.0)
    h = jnp.dot(h.astype(bf), params["w2"].astype(bf),
                preferred_element_type=jnp.float32)
    h = jnp.maximum(ln(h, params["g2"], params["b2"]), 0.0)
    h = jnp.dot(h.astype(bf), params["w3"].astype(bf),
                preferred_element_type=jnp.float32) + params["b3"]
    return h.reshape(B, S, -1)


def init_params(key, d_in, h1, h2, d_out, dtype=jnp.float32):
    """Deterministic synthetic init (shapes match the PyTorch module params)."""
    ks = jax.random.split(key, 7)
    scale = 0.1
    return {
        # PyTorch Linear weight is (out, in); stored here transposed (in, out).
        "w1": scale * jax.random.normal(ks[0], (d_in, h1), dtype),
        "g1": 1.0 + scale * jax.random.normal(ks[1], (1, h1), dtype),
        "b1": scale * jax.random.normal(ks[2], (1, h1), dtype),
        "w2": scale * jax.random.normal(ks[3], (h1, h2), dtype),
        "g2": 1.0 + scale * jax.random.normal(ks[4], (1, h2), dtype),
        "b2": scale * jax.random.normal(ks[5], (1, h2), dtype),
        "w3": scale * jax.random.normal(ks[6], (h2, d_out), dtype),
        "b3": jnp.linspace(-0.5, 0.5, d_out, dtype=dtype).reshape(1, d_out),
    }


if __name__ == "__main__":
    # Small shapes: batch=2, seq=8, input_dim=16, hidden_dims=[32, 32], output_dim=16
    B, S, D_in, H1, H2, D_out = 2, 8, 16, 32, 32, 16

    key = jax.random.PRNGKey(0)
    kx, kp = jax.random.split(key)
    x = jax.random.normal(kx, (B, S, D_in), jnp.float32)
    params = init_params(kp, D_in, H1, H2, D_out)

    out = generic_mlp_pallas(x, params)
    out = jax.block_until_ready(out)

    ref = generic_mlp_reference(x, params)
    assert out.shape == (B, S, D_out)
    assert jnp.allclose(out, ref, atol=2e-3, rtol=2e-3), "mismatch vs reference"

    # TODO(synk): dropout / BatchNorm1d (training-mode batch stats) variants of
    # GenericMLP are not exercised here; this covers the ln/relu/no-dropout config.
    print("KERNEL_OK")
</pallas_src>

<mosaic_0001>
module attributes {stable_mosaic.version = 11 : i64} {
  func.func @generic_mlp_kernel(%arg0: i32, %arg1: memref<16x128xbf16, #tpu.memory_space<vmem>>, %arg2: memref<128x128xbf16, #tpu.memory_space<vmem>>, %arg3: memref<1x128xf32, #tpu.memory_space<vmem>>, %arg4: memref<1x128xf32, #tpu.memory_space<vmem>>, %arg5: memref<128x128xbf16, #tpu.memory_space<vmem>>, %arg6: memref<1x128xf32, #tpu.memory_space<vmem>>, %arg7: memref<1x128xf32, #tpu.memory_space<vmem>>, %arg8: memref<128x128xbf16, #tpu.memory_space<vmem>>, %arg9: memref<1x128xf32, #tpu.memory_space<vmem>>, %arg10: memref<16x128xf32, #tpu.memory_space<vmem>>) attributes {dimension_semantics = [#tpu.dimension_semantics<parallel>], iteration_bounds = array<i64: 1>, scalar_prefetch = 0 : i64, scratch_operands = 0 : i64, tpu.core_type = #tpu.core_type<tc>, window_params = [{transform_indices = @transform_0, window_bounds = array<i64: 16, 128>}, {pipeline_mode = #tpu.pipeline_mode<synchronous>, transform_indices = @transform_1, window_bounds = array<i64: 128, 128>}, {pipeline_mode = #tpu.pipeline_mode<synchronous>, transform_indices = @transform_2, window_bounds = array<i64: 1, 128>}, {pipeline_mode = #tpu.pipeline_mode<synchronous>, transform_indices = @transform_3, window_bounds = array<i64: 1, 128>}, {pipeline_mode = #tpu.pipeline_mode<synchronous>, transform_indices = @transform_4, window_bounds = array<i64: 128, 128>}, {pipeline_mode = #tpu.pipeline_mode<synchronous>, transform_indices = @transform_5, window_bounds = array<i64: 1, 128>}, {pipeline_mode = #tpu.pipeline_mode<synchronous>, transform_indices = @transform_6, window_bounds = array<i64: 1, 128>}, {pipeline_mode = #tpu.pipeline_mode<synchronous>, transform_indices = @transform_7, window_bounds = array<i64: 128, 128>}, {pipeline_mode = #tpu.pipeline_mode<synchronous>, transform_indices = @transform_8, window_bounds = array<i64: 1, 128>}, {transform_indices = @transform_9, window_bounds = array<i64: 16, 128>}]} {
    %c0 = arith.constant 0 : index
    %c0_0 = arith.constant 0 : index
    %0 = vector.load %arg1[%c0, %c0_0] : memref<16x128xbf16, #tpu.memory_space<vmem>>, vector<16x128xbf16>
    %c0_1 = arith.constant 0 : index
    %c0_2 = arith.constant 0 : index
    %1 = vector.load %arg2[%c0_1, %c0_2] : memref<128x128xbf16, #tpu.memory_space<vmem>>, vector<128x128xbf16>
    %cst = arith.constant dense<0.000000e+00> : vector<16x128xf32>
    %2 = tpu.matmul %0, %1, %cst {dimension_numbers = #tpu.dot_dimension_numbers<[1], [0], [0], [1], [0, 0, 1, 1], [], []>} : vector<16x128xbf16>, vector<128x128xbf16>, vector<16x128xf32> -> vector<16x128xf32>
    %c0_3 = arith.constant 0 : index
    %c0_4 = arith.constant 0 : index
    %3 = vector.load %arg3[%c0_3, %c0_4] : memref<1x128xf32, #tpu.memory_space<vmem>>, vector<1x128xf32>
    %c0_5 = arith.constant 0 : index
    %c0_6 = arith.constant 0 : index
    %4 = vector.load %arg4[%c0_5, %c0_6] : memref<1x128xf32, #tpu.memory_space<vmem>>, vector<1x128xf32>
    %cst_7 = arith.constant dense<0.000000e+00> : vector<16xf32>
    %5 = vector.multi_reduction <add>, %2, %cst_7 [1] : vector<16x128xf32> to vector<16xf32>
    %6 = vector.shape_cast %5 : vector<16xf32> to vector<16x1xf32>
    %cst_8 = arith.constant 3.125000e-02 : f32
    %7 = vector.broadcast %cst_8 : f32 to vector<16x1xf32>
    %8 = arith.mulf %6, %7 : vector<16x1xf32>
    %9 = arith.mulf %2, %2 : vector<16x128xf32>
    %cst_9 = arith.constant dense<0.000000e+00> : vector<16xf32>
    %10 = vector.multi_reduction <add>, %9, %cst_9 [1] : vector<16x128xf32> to vector<16xf32>
    %11 = vector.shape_cast %10 : vector<16xf32> to vector<16x1xf32>
    %cst_10 = arith.constant 3.125000e-02 : f32
    %12 = vector.broadcast %cst_10 : f32 to vector<16x1xf32>
    %13 = arith.mulf %11, %12 : vector<16x1xf32>
    %14 = arith.mulf %8, %8 : vector<16x1xf32>
    %15 = arith.subf %13, %14 : vector<16x1xf32>
    %16 = vector.broadcast %8 : vector<16x1xf32> to vector<16x128xf32>
    %17 = arith.subf %2, %16 : vector<16x128xf32>
    %cst_11 = arith.constant 9.99999974E-6 : f32
    %18 = vector.broadcast %cst_11 : f32 to vector<16x1xf32>
    %19 = arith.addf %15, %18 : vector<16x1xf32>
    %20 = math.rsqrt %19 : vector<16x1xf32>
    %21 = vector.broadcast %20 : vector<16x1xf32> to vector<16x128xf32>
    %22 = arith.mulf %17, %21 : vector<16x128xf32>
    %23 = vector.broadcast %3 : vector<1x128xf32> to vector<16x128xf32>
    %24 = arith.mulf %22, %23 : vector<16x128xf32>
    %25 = vector.broadcast %4 : vector<1x128xf32> to vector<16x128xf32>
    %26 = arith.addf %24, %25 : vector<16x128xf32>
    %cst_12 = arith.constant 0.000000e+00 : f32
    %27 = vector.broadcast %cst_12 : f32 to vector<16x128xf32>
    %28 = arith.maximumf %26, %27 : vector<16x128xf32>
    %29 = arith.truncf %28 : vector<16x128xf32> to vector<16x128xbf16>
    %c0_13 = arith.constant 0 : index
    %c0_14 = arith.constant 0 : index
    %30 = vector.load %arg5[%c0_13, %c0_14] : memref<128x128xbf16, #tpu.memory_space<vmem>>, vector<128x128xbf16>
    %cst_15 = arith.constant dense<0.000000e+00> : vector<16x128xf32>
    %31 = tpu.matmul %29, %30, %cst_15 {dimension_numbers = #tpu.dot_dimension_numbers<[1], [0], [0], [1], [0, 0, 1, 1], [], []>} : vector<16x128xbf16>, vector<128x128xbf16>, vector<16x128xf32> -> vector<16x128xf32>
    %c0_16 = arith.constant 0 : index
    %c0_17 = arith.constant 0 : index
    %32 = vector.load %arg6[%c0_16, %c0_17] : memref<1x128xf32, #tpu.memory_space<vmem>>, vector<1x128xf32>
    %c0_18 = arith.constant 0 : index
    %c0_19 = arith.constant 0 : index
    %33 = vector.load %arg7[%c0_18, %c0_19] : memref<1x128xf32, #tpu.memory_space<vmem>>, vector<1x128xf32>
    %cst_20 = arith.constant dense<0.000000e+00> : vector<16xf32>
    %34 = vector.multi_reduction <add>, %31, %cst_20 [1] : vector<16x128xf32> to vector<16xf32>
    %35 = vector.shape_cast %34 : vector<16xf32> to vector<16x1xf32>
    %cst_21 = arith.constant 3.125000e-02 : f32
    %36 = vector.broadcast %cst_21 : f32 to vector<16x1xf32>
    %37 = arith.mulf %35, %36 : vector<16x1xf32>
    %38 = arith.mulf %31, %31 : vector<16x128xf32>
    %cst_22 = arith.constant dense<0.000000e+00> : vector<16xf32>
    %39 = vector.multi_reduction <add>, %38, %cst_22 [1] : vector<16x128xf32> to vector<16xf32>
    %40 = vector.shape_cast %39 : vector<16xf32> to vector<16x1xf32>
    %cst_23 = arith.constant 3.125000e-02 : f32
    %41 = vector.broadcast %cst_23 : f32 to vector<16x1xf32>
    %42 = arith.mulf %40, %41 : vector<16x1xf32>
    %43 = arith.mulf %37, %37 : vector<16x1xf32>
    %44 = arith.subf %42, %43 : vector<16x1xf32>
    %45 = vector.broadcast %37 : vector<16x1xf32> to vector<16x128xf32>
    %46 = arith.subf %31, %45 : vector<16x128xf32>
    %cst_24 = arith.constant 9.99999974E-6 : f32
    %47 = vector.broadcast %cst_24 : f32 to vector<16x1xf32>
    %48 = arith.addf %44, %47 : vector<16x1xf32>
    %49 = math.rsqrt %48 : vector<16x1xf32>
    %50 = vector.broadcast %49 : vector<16x1xf32> to vector<16x128xf32>
    %51 = arith.mulf %46, %50 : vector<16x128xf32>
    %52 = vector.broadcast %32 : vector<1x128xf32> to vector<16x128xf32>
    %53 = arith.mulf %51, %52 : vector<16x128xf32>
    %54 = vector.broadcast %33 : vector<1x128xf32> to vector<16x128xf32>
    %55 = arith.addf %53, %54 : vector<16x128xf32>
    %cst_25 = arith.constant 0.000000e+00 : f32
    %56 = vector.broadcast %cst_25 : f32 to vector<16x128xf32>
    %57 = arith.maximumf %55, %56 : vector<16x128xf32>
    %58 = arith.truncf %57 : vector<16x128xf32> to vector<16x128xbf16>
    %c0_26 = arith.constant 0 : index
    %c0_27 = arith.constant 0 : index
    %59 = vector.load %arg8[%c0_26, %c0_27] : memref<128x128xbf16, #tpu.memory_space<vmem>>, vector<128x128xbf16>
    %cst_28 = arith.constant dense<0.000000e+00> : vector<16x128xf32>
    %60 = tpu.matmul %58, %59, %cst_28 {dimension_numbers = #tpu.dot_dimension_numbers<[1], [0], [0], [1], [0, 0, 1, 1], [], []>} : vector<16x128xbf16>, vector<128x128xbf16>, vector<16x128xf32> -> vector<16x128xf32>
    %c0_29 = arith.constant 0 : index
    %c0_30 = arith.constant 0 : index
    %61 = vector.load %arg9[%c0_29, %c0_30] : memref<1x128xf32, #tpu.memory_space<vmem>>, vector<1x128xf32>
    %62 = vector.broadcast %61 : vector<1x128xf32> to vector<16x128xf32>
    %63 = arith.addf %60, %62 : vector<16x128xf32>
    %c0_31 = arith.constant 0 : index
    %c0_32 = arith.constant 0 : index
    %64 = vector.load %arg10[%c0_31, %c0_32] : memref<16x128xf32, #tpu.memory_space<vmem>>, vector<16x128xf32>
    tpu.vector_store %arg10[%c0_31, %c0_32], %63 {strides = array<i32>} : memref<16x128xf32, #tpu.memory_space<vmem>>, vector<16x128xf32>,
    return
  }
  func.func @transform_0(%arg0: i32) -> (i32, i32) {
    %c0_i32 = arith.constant 0 : i32
    %c0_i32_0 = arith.constant 0 : i32
    return %arg0, %c0_i32 : i32, i32
  }
  func.func @transform_1(%arg0: i32) -> (i32, i32) {
    %c0_i32 = arith.constant 0 : i32
    %c0_i32_0 = arith.constant 0 : i32
    %c0_i32_1 = arith.constant 0 : i32
    return %c0_i32, %c0_i32_0 : i32, i32
  }
  func.func @transform_2(%arg0: i32) -> (i32, i32) {
    %c0_i32 = arith.constant 0 : i32
    %c0_i32_0 = arith.constant 0 : i32
    %c0_i32_1 = arith.constant 0 : i32
    return %c0_i32, %c0_i32_0 : i32, i32
  }
  func.func @transform_3(%arg0: i32) -> (i32, i32) {
    %c0_i32 = arith.constant 0 : i32
    %c0_i32_0 = arith.constant 0 : i32
    %c0_i32_1 = arith.constant 0 : i32
    return %c0_i32, %c0_i32_0 : i32, i32
  }
  func.func @transform_4(%arg0: i32) -> (i32, i32) {
    %c0_i32 = arith.constant 0 : i32
    %c0_i32_0 = arith.constant 0 : i32
    %c0_i32_1 = arith.constant 0 : i32
    return %c0_i32, %c0_i32_0 : i32, i32
  }
  func.func @transform_5(%arg0: i32) -> (i32, i32) {
    %c0_i32 = arith.constant 0 : i32
    %c0_i32_0 = arith.constant 0 : i32
    %c0_i32_1 = arith.constant 0 : i32
    return %c0_i32, %c0_i32_0 : i32, i32
  }
  func.func @transform_6(%arg0: i32) -> (i32, i32) {
    %c0_i32 = arith.constant 0 : i32
    %c0_i32_0 = arith.constant 0 : i32
    %c0_i32_1 = arith.constant 0 : i32
    return %c0_i32, %c0_i32_0 : i32, i32
  }
  func.func @transform_7(%arg0: i32) -> (i32, i32) {
    %c0_i32 = arith.constant 0 : i32
    %c0_i32_0 = arith.constant 0 : i32
    %c0_i32_1 = arith.constant 0 : i32
    return %c0_i32, %c0_i32_0 : i32, i32
  }
  func.func @transform_8(%arg0: i32) -> (i32, i32) {
    %c0_i32 = arith.constant 0 : i32
    %c0_i32_0 = arith.constant 0 : i32
    %c0_i32_1 = arith.constant 0 : i32
    return %c0_i32, %c0_i32_0 : i32, i32
  }
  func.func @transform_9(%arg0: i32) -> (i32, i32) {
    %c0_i32 = arith.constant 0 : i32
    %c0_i32_0 = arith.constant 0 : i32
    return %arg0, %c0_i32 : i32, i32
  }
}

</mosaic_0001>

<bundles_post_ra>
// kernel: tpu_custom_call.1
= control target key start
LH: loop header
LB: loop body
LE: loop exit
PB: predicated region body
PF: predicated region fallthrough
CT: control target
= control target key end

     0   :  { %14 = vsyncpa [#allocation3], 0  ;;  %s1005_s0 = inlined_call_operand.hbm [shape: bf16[16,128], index: 0, kind: input, shape index: {}]   ;;  %s1006_s1 = inlined_call_operand.hbm [shape: bf16[128,128], index: 1, kind: input, shape index: {}]   ;;  %s1007_s2 = inlined_call_operand.vmem [shape: f32[1,128], index: 2, kind: input, shape index: {}]   ;;  %s1008_s3 = inlined_call_operand.vmem [shape: f32[1,128], index: 3, kind: input, shape index: {}]   ;;  %s1009_s4 = inlined_call_operand.hbm [shape: bf16[128,128], index: 4, kind: input, shape index: {}]   ;;  %s1010_s5 = inlined_call_operand.vmem [shape: f32[1,128], index: 5, kind: input, shape index: {}]   ;;  %s1011_s6 = inlined_call_operand.vmem [shape: f32[1,128], index: 6, kind: input, shape index: {}]   ;;  %s1012_s7 = inlined_call_operand.hbm [shape: bf16[128,128], index: 7, kind: input, shape index: {}]   ;;  %s1013_s8 = inlined_call_operand.vmem [shape: f32[1,128], index: 8, kind: input, shape index: {}]   ;;  %s1014_s9 = inlined_call_operand.hbm [shape: f32[16,128], index: 9, kind: output, shape index: {}]  }
   0x1   :  { %15 = vsyncpa [#allocation6], 0 }
   0x2   :  { %16 = vsyncpa [#allocation9], 0 }
   0x3   :  { %17 = vsyncpa [#allocation4], 0  ;;  %s813_s30 = smov [#allocation5]   ;;  %s814_s11 = smov [#allocation2]  }
   0x4   :  { %s35_s10 = sshll.u32 %s813_s30, 4  ;;  %s23_s12 = sshll.u32 %s814_s11, 4  ;;  %s36_s10 = int_to_ptr.vmem [resolvable:$true] %s35_s10  ;;  %s874_s12 = int_to_ptr.vmem [resolvable:$true] %s23_s12 }
   0x5   :  { %s695_s15 = scalar_lea.hbm %s1006_s1, 1024 }
   0x6   :  { %p696_p0 = scmp.ne.s32.totalorder %s1006_s1, %s695_s15  ;;  %p699_p1 = scmp.lt.u32.totalorder %s695_s15, %s1006_s1 }
   0x8   :  { %p701_p2 = pnand %p699_p1, %p696_p0 }
   0xa   :  { %704 = shalt.err (!%p701_p2)
}
   0xb   :  { %s705_s20 = scalar_lea.vmem %s36_s10, 1024  ;;  %p710_p4 = scmp.lt.s32.totalorder %s36_s10, %s36_s10 }
   0xc   :  { %p706_p3 = scmp.ne.s32.totalorder %s36_s10, %s705_s20  ;;  %p711_p5 = scmp.lt.s32.totalorder %s705_s20, %s705_s20 }
   0xe   :  { %p712_p6 = por %p711_p5, %p710_p4 }
  0x10   :  { %p713_p7 = pnand %p712_p6, %p706_p3 }
  0x12   :  { %716 = shalt.err (!%p713_p7)
}
  0x13   :  { %s815_s21 = smov 64   ;;  %s816_s22 = smov 4  }
  0x14   :  { %41 = dma.hbm_to_vmem [thread:$0]  %s1006_s1, 1024, %s36_s10, [#allocation6], %s815_s21, %s815_s21, %s816_s22  }
  0x15   :  { %s717_s27 = scalar_lea.hbm %s1005_s0, 128 }
  0x16   :  { %p718_p8 = scmp.ne.s32.totalorder %s1005_s0, %s717_s27  ;;  %p721_p9 = scmp.lt.u32.totalorder %s717_s27, %s1005_s0 }
  0x18   :  { %p723_p10 = pnand %p721_p9, %p718_p8 }
  0x1a   :  { %726 = shalt.err (!%p723_p10)
}
  0x1b   :  { %s727_s13 = scalar_lea.vmem %s874_s12, 128  ;;  %p732_p12 = scmp.lt.s32.totalorder %s874_s12, %s874_s12 }
  0x1c   :  { %p728_p11 = scmp.ne.s32.totalorder %s874_s12, %s727_s13  ;;  %p733_p13 = scmp.lt.s32.totalorder %s727_s13, %s727_s13 }
  0x1e   :  { %p734_p0 = por %p733_p13, %p732_p12 }
  0x20   :  { %p735_p1 = pnand %p734_p0, %p728_p11 }
  0x22   :  { %738 = shalt.err (!%p735_p1)
}
  0x23   :  { %29 = dma.hbm_to_vmem [thread:$0]  %s1005_s0, 128, %s874_s12, [#allocation3], %s815_s21, %s815_s21, %s816_s22  }
  0x24   :  { %s817_s14 = smov [#allocation7]   ;;  %s818_s16 = smov [#allocation8]  }
  0x25   :  { %s51_s15 = sshll.u32 %s817_s14, 4  ;;  %s67_s17 = sshll.u32 %s818_s16, 4  ;;  %s52_s15 = int_to_ptr.vmem [resolvable:$true] %s51_s15  ;;  %s911_s17 = int_to_ptr.vmem [resolvable:$true] %s67_s17 }
  0x26   :  { %s739_s20 = scalar_lea.hbm %s1009_s4, 1024 }
  0x27   :  { %p740_p2 = scmp.ne.s32.totalorder %s1009_s4, %s739_s20  ;;  %p743_p3 = scmp.lt.u32.totalorder %s739_s20, %s1009_s4 }
  0x29   :  { %p745_p4 = pnand %p743_p3, %p740_p2 }
  0x2b   :  { %748 = shalt.err (!%p745_p4)
}
  0x2c   :  { %s749_s0 = scalar_lea.vmem %s52_s15, 1024  ;;  %p754_p6 = scmp.lt.s32.totalorder %s52_s15, %s52_s15 }
  0x2d   :  { %p750_p5 = scmp.ne.s32.totalorder %s52_s15, %s749_s0  ;;  %p755_p7 = scmp.lt.s32.totalorder %s749_s0, %s749_s0 }
  0x2f   :  { %p756_p8 = por %p755_p7, %p754_p6 }
  0x31   :  { %p757_p9 = pnand %p756_p8, %p750_p5 }
  0x33   :  { %760 = shalt.err (!%p757_p9)
}
  0x34   :  { %57 = dma.hbm_to_vmem [thread:$0]  %s1009_s4, 1024, %s52_s15, [#allocation6], %s815_s21, %s815_s21, %s816_s22  }
  0x35   :  { %s761_s30 = scalar_lea.hbm %s1012_s7, 1024 }
  0x36   :  { %p762_p10 = scmp.ne.s32.totalorder %s1012_s7, %s761_s30  ;;  %p765_p11 = scmp.lt.u32.totalorder %s761_s30, %s1012_s7 }
  0x38   :  { %p767_p12 = pnand %p765_p11, %p762_p10 }
  0x3a   :  { %770 = shalt.err (!%p767_p12)
}
  0x3b   :  { %s771_s14 = scalar_lea.vmem %s911_s17, 1024  ;;  %p776_p0 = scmp.lt.s32.totalorder %s911_s17, %s911_s17 }
  0x3c   :  { %p772_p13 = scmp.ne.s32.totalorder %s911_s17, %s771_s14  ;;  %p777_p1 = scmp.lt.s32.totalorder %s771_s14, %s771_s14 }
  0x3e   :  { %p778_p2 = por %p777_p1, %p776_p0 }
  0x40   :  { %p779_p3 = pnand %p778_p2, %p772_p13 }
  0x42   :  { %782 = shalt.err (!%p779_p3)
}
  0x43   :  { %73 = dma.hbm_to_vmem [thread:$0]  %s1012_s7, 1024, %s911_s17, [#allocation9], %s815_s21, %s815_s21, %s816_s22  }
  0x44   :  { %805 = dma.done.wait [#allocation3], 128  }
  0x45   :  { %806 = vsyncadd [#allocation3], 4294967168 }
  0x46   :  { %807 = dma.done.wait [#allocation6], 2048  }
  0x47   :  { %808 = vsyncadd [#allocation6], 4294965248 }
  0x48   :  { %809 = dma.done.wait [#allocation9], 1024  }
  0x49   :  { %810 = vsyncadd [#allocation9], 4294966272  ;;  %v819_v0 = vmov 0.0   ;;  %vm820_vm0 = vmmov 0   ;;  %v662_v1 = vld [vmem:[#allocation5] sm:$0xff]   ;;  %v663_v2 = vld [vmem:[#allocation5 + $0x8] sm:$0xff]  }
  0x4a   :  { %591 = vmatprep.subr.bf16.mxu0 %v819_v0  ;;  %607 = vmatprep.mubr.msk.bf16.mxu0 %vm820_vm0, %v819_v0  ;;  %v664_v3 = vld [vmem:[#allocation5 + $0x10] sm:$0xff]   ;;  %v665_v4 = vld [vmem:[#allocation5 + $0x18] sm:$0xff]   ;;  %v666_v5 = vld [vmem:[#allocation5 + $0x20] sm:$0xff]  }
  0x4b   :  { %611 = vmatprep.subr.bf16.mxu1 %v819_v0  ;;  %627 = vmatprep.mubr.msk.bf16.mxu1 %vm820_vm0, %v819_v0  ;;  %v667_v6 = vld [vmem:[#allocation5 + $0x28] sm:$0xff]   ;;  %v668_v7 = vld [vmem:[#allocation5 + $0x30] sm:$0xff]   ;;  %v669_v8 = vld [vmem:[#allocation5 + $0x38] sm:$0xff]  }
  0x4c   :  { %592 = vmatpush3.bf16.msra.mxu0 %v662_v1  ;;  %v670_v9 = vld [vmem:[#allocation2] sm:$0xff]   ;;  %v671_v16 = vld [vmem:[#allocation7] sm:$0xff]   ;;  %v672_v17 = vld [vmem:[#allocation7 + $0x8] sm:$0xff]  }
  0x4d   :  { %593 = vmatprep.subr.bf16.mxu0 %v819_v0  ;;  %612 = vmatpush3.bf16.msra.mxu1 %v671_v16  ;;  %v673_v18 = vld [vmem:[#allocation7 + $0x10] sm:$0xff]   ;;  %v674_v19 = vld [vmem:[#allocation7 + $0x18] sm:$0xff]   ;;  %v675_v20 = vld [vmem:[#allocation7 + $0x20] sm:$0xff]  }
  0x4e   :  { %613 = vmatprep.subr.bf16.mxu1 %v819_v0  ;;  %v676_v21 = vld [vmem:[#allocation7 + $0x28] sm:$0xff]   ;;  %v677_v22 = vld [vmem:[#allocation7 + $0x30] sm:$0xff]   ;;  %v678_v23 = vld [vmem:[#allocation7 + $0x38] sm:$0xff]  }
  0x4f   :  { %v543_v40 = vld [vmem:[%s1007_s2] ss:$0 sm:$0xff]  ;;  %v679_v59 = vld [vmem:[#allocation8] sm:$0xff]   ;;  %v680_v60 = vld [vmem:[#allocation8 + $0x8] sm:$0xff]  }
  0x50   :  { %594 = vmatpush3.bf16.msra.mxu0 %v663_v2  ;;  %v544_v45 = vld [vmem:[%s1008_s3] ss:$0 sm:$0xff]  ;;  %v681_v61 = vld [vmem:[#allocation8 + $0x10] sm:$0xff]   ;;  %v683_v63 = vld [vmem:[#allocation8 + $0x20] sm:$0xff]  }
  0x51   :  { %595 = vmatprep.subr.bf16.mxu0 %v819_v0  ;;  %614 = vmatpush3.bf16.msra.mxu1 %v672_v17  ;;  %v682_v62 = vld [vmem:[#allocation8 + $0x18] sm:$0xff]   ;;  %v684_v1 = vld [vmem:[#allocation8 + $0x28] sm:$0xff]   ;;  %v685_v2 = vld [vmem:[#allocation8 + $0x30] sm:$0xff]  }
  0x52   :  { %615 = vmatprep.subr.bf16.mxu1 %v819_v0 }
  0x54   :  { %596 = vmatpush3.bf16.msra.mxu0 %v664_v3  ;;  %v686_v3 = vld [vmem:[#allocation8 + $0x38] sm:$0xff]  }
  0x55   :  { %597 = vmatprep.subr.bf16.mxu0 %v819_v0  ;;  %616 = vmatpush3.bf16.msra.mxu1 %v673_v18 }
  0x56   :  { %617 = vmatprep.subr.bf16.mxu1 %v819_v0 }
  0x58   :  { %598 = vmatpush3.bf16.msra.mxu0 %v665_v4 }
  0x59   :  { %599 = vmatprep.subr.bf16.mxu0 %v819_v0  ;;  %618 = vmatpush3.bf16.msra.mxu1 %v674_v19 }
  0x5a   :  { %619 = vmatprep.subr.bf16.mxu1 %v819_v0 }
  0x5c   :  { %600 = vmatpush3.bf16.msra.mxu0 %v666_v5 }
  0x5d   :  { %601 = vmatprep.subr.bf16.mxu0 %v819_v0  ;;  %620 = vmatpush3.bf16.msra.mxu1 %v675_v20 }
  0x5e   :  { %621 = vmatprep.subr.bf16.mxu1 %v819_v0 }
  0x60   :  { %602 = vmatpush3.bf16.msra.mxu0 %v667_v6 }
  0x61   :  { %603 = vmatprep.subr.bf16.mxu0 %v819_v0  ;;  %622 = vmatpush3.bf16.msra.mxu1 %v676_v21 }
  0x62   :  { %623 = vmatprep.subr.bf16.mxu1 %v819_v0 }
  0x64   :  { %604 = vmatpush3.bf16.msra.mxu0 %v668_v7 }
  0x65   :  { %605 = vmatprep.subr.bf16.mxu0 %v819_v0  ;;  %624 = vmatpush3.bf16.msra.mxu1 %v677_v22 }
  0x66   :  { %625 = vmatprep.subr.bf16.mxu1 %v819_v0 }
  0x68   :  { %606 = vmatpush3.bf16.msra.mxu0 %v669_v8 }
  0x69   :  { %631 = vmatprep.subr.bf16.mxu0 %v819_v0  ;;  %626 = vmatpush3.bf16.msra.mxu1 %v678_v23  ;;  %v554_v23 = vld [vmem:[%s1011_s6] ss:$0 sm:$0xff] }
  0x6b   :  { %608 = vmatmul.mubr.bf16.vlgmr.msra.gmra.mrb[0].mxu0 %v670_v9 }
  0x6c   :  { %647 = vmatprep.mubr.msk.bf16.mxu0 %vm820_vm0, %v819_v0  ;;  %632 = vmatpush3.bf16.msra.mxu0 %v679_v59 }
  0x6d   :  { %633 = vmatprep.subr.bf16.mxu0 %v819_v0 }
  0x70   :  { %634 = vmatpush3.bf16.msra.mxu0 %v680_v60 }
  0x71   :  { %635 = vmatprep.subr.bf16.mxu0 %v819_v0 }
  0x74   :  { %636 = vmatpush3.bf16.msra.mxu0 %v681_v61 }
  0x75   :  { %637 = vmatprep.subr.bf16.mxu0 %v819_v0 }
  0x78   :  { %638 = vmatpush3.bf16.msra.mxu0 %v682_v62 }
  0x79   :  { %639 = vmatprep.subr.bf16.mxu0 %v819_v0 }
  0x7c   :  { %640 = vmatpush3.bf16.msra.mxu0 %v683_v63 }
  0x7d   :  { %641 = vmatprep.subr.bf16.mxu0 %v819_v0 }
  0x80   :  { %642 = vmatpush3.bf16.msra.mxu0 %v684_v1 }
  0x81   :  { %643 = vmatprep.subr.bf16.mxu0 %v819_v0 }
  0x84   :  { %644 = vmatpush3.bf16.msra.mxu0 %v685_v2 }
  0x85   :  { %645 = vmatprep.subr.bf16.mxu0 %v819_v0  ;;  %v553_v0 = vld [vmem:[%s1010_s5] ss:$0 sm:$0xff]  ;;  %s821_s5 = smov [#allocation10]  }
  0x86   :  { %s520_s23 = sshll.u32 %s821_s5, 4  ;;  %s521_s23 = int_to_ptr.vmem [resolvable:$true] %s520_s23 }
  0x87   :  { %s783_s6 = scalar_lea.vmem %s521_s23, 256  ;;  %p788_p5 = scmp.lt.s32.totalorder %s521_s23, %s521_s23 }
  0x88   :  { %646 = vmatpush3.bf16.msra.mxu0 %v686_v3  ;;  %p784_p4 = scmp.ne.s32.totalorder %s521_s23, %s783_s6  ;;  %p789_p6 = scmp.lt.s32.totalorder %s783_s6, %s783_s6 }
  0x8a   :  { %p790_p7 = por %p789_p6, %p788_p5 }
  0x8c   :  { %p791_p8 = pnand %p790_p7, %p784_p4 }
 0x13e   :  { %v195_v10 = vpop.f32.mrb[0].mxu0 }
 0x13f   :  { %204 = vadd.xlane.f32.xlu0 %v195_v10  ;;  %v609_v11 = vpop.f32.mrb[1].mxu0  ;;  %v210_v12 = vmul.f32 %v195_v10, %v195_v10 }
 0x140   :  { %v198_v13 = vpop.f32.mrb[2].mxu0 }
 0x141   :  { %212 = vadd.xlane.f32.xlu1 %v210_v12  ;;  %v610_v14 = vpop.f32.mrb[3].mxu0  ;;  %v211_v15 = vmul.f32 %v198_v13, %v198_v13 }
 0x143   :  { %206 = vadd.xlane.f32.xlu0 %v198_v13 }
 0x145   :  { %214 = vadd.xlane.f32.xlu1 %v211_v15 }
 0x1cc   :  { %v205_v24 = vpop.xlane.xlu0 %204 }
 0x1cd   :  { %v208_v25 = vmul.f32 0.03125, %v205_v24 }
 0x1ce   :  { %v213_v26 = vpop.xlane.xlu1 %212 }
 0x1cf   :  { %v218_v27 = vmul.f32 %v208_v25, %v208_v25  ;;  %v216_v28 = vmul.f32 0.03125, %v213_v26  ;;  %v222_v38 = vsub.f32 %v195_v10, %v208_v25 }
 0x1d0   :  { %v207_v29 = vpop.xlane.xlu0 %206 }
 0x1d1   :  { %v220_v30 = vsub.f32 %v216_v28, %v218_v27  ;;  %v209_v31 = vmul.f32 0.03125, %v207_v29 }
 0x1d2   :  { %v215_v32 = vpop.xlane.xlu1 %214 }
 0x1d3   :  { %v224_v33 = vadd.f32 1e-05, %v220_v30  ;;  %v219_v34 = vmul.f32 %v209_v31, %v209_v31  ;;  %v217_v35 = vmul.f32 0.03125, %v215_v32  ;;  %v223_v42 = vsub.f32 %v198_v13, %v209_v31  ;;  %v555_v32 = vld [vmem:[%s1013_s8] ss:$0 sm:$0xff] }
 0x1d5   :  { %687 = vrsqrt.f32 %v224_v33  ;;  %v221_v36 = vsub.f32 %v217_v35, %v219_v34 }
 0x1d7   :  { %v225_v37 = vadd.f32 1e-05, %v221_v36 }
 0x1d9   :  { %689 = vrsqrt.f32 %v225_v37 }
 0x1df   :  { %v688_v39 = vpop.eup %687 }
 0x1e0   :  { %v228_v41 = vmul.f32 %v688_v39, %v222_v38 }
 0x1e2   :  { %v236_v43 = vmul.f32 %v543_v40, %v228_v41 }
 0x1e3   :  { %v690_v44 = vpop.eup %689 }
 0x1e4   :  { %v229_v46 = vmul.f32 %v690_v44, %v223_v42  ;;  %v244_v48 = vadd.f32 %v544_v45, %v236_v43 }
 0x1e6   :  { %v237_v47 = vmul.f32 %v543_v40, %v229_v46  ;;  %v246_v50 = vmax.f32 %v244_v48, 0.0 }
 0x1e8   :  { %v245_v49 = vadd.f32 %v544_v45, %v237_v47 }
 0x1ea   :  { %v247_v51 = vmax.f32 %v245_v49, 0.0 }
 0x1ec   :  { %v248_v52 = vpack.c.bf16 %v247_v51, %v246_v50 }
 0x1ee   :  { %628 = vmatmul.mubr.bf16.vlgmr.msra.gmra.mrb[0].mxu1 %v248_v52 }
 0x2c1   :  { %v347_v53 = vpop.f32.mrb[0].mxu1 }
 0x2c2   :  { %356 = vadd.xlane.f32.xlu0 %v347_v53  ;;  %v629_v54 = vpop.f32.mrb[1].mxu1  ;;  %v362_v57 = vmul.f32 %v347_v53, %v347_v53 }
 0x2c3   :  { %v350_v55 = vpop.f32.mrb[2].mxu1 }
 0x2c4   :  { %358 = vadd.xlane.f32.xlu1 %v350_v55  ;;  %v630_v56 = vpop.f32.mrb[3].mxu1  ;;  %v363_v58 = vmul.f32 %v350_v55, %v350_v55 }
 0x2c6   :  { %364 = vadd.xlane.f32.xlu0 %v362_v57 }
 0x2c8   :  { %366 = vadd.xlane.f32.xlu1 %v363_v58 }
 0x34f   :  { %v357_v4 = vpop.xlane.xlu0 %356 }
 0x350   :  { %v360_v5 = vmul.f32 0.03125, %v357_v4 }
 0x351   :  { %v359_v6 = vpop.xlane.xlu1 %358 }
 0x352   :  { %v361_v7 = vmul.f32 0.03125, %v359_v6  ;;  %v370_v9 = vmul.f32 %v360_v5, %v360_v5  ;;  %v374_v18 = vsub.f32 %v347_v53, %v360_v5 }
 0x353   :  { %v365_v8 = vpop.xlane.xlu0 %364 }
 0x354   :  { %v368_v10 = vmul.f32 0.03125, %v365_v8  ;;  %v371_v12 = vmul.f32 %v361_v7, %v361_v7  ;;  %v375_v20 = vsub.f32 %v350_v55, %v361_v7 }
 0x355   :  { %v367_v11 = vpop.xlane.xlu1 %366 }
 0x356   :  { %v372_v13 = vsub.f32 %v368_v10, %v370_v9  ;;  %v369_v14 = vmul.f32 0.03125, %v367_v11 }
 0x358   :  { %v376_v15 = vadd.f32 1e-05, %v372_v13  ;;  %v373_v16 = vsub.f32 %v369_v14, %v371_v12 }
 0x35a   :  { %691 = vrsqrt.f32 %v376_v15  ;;  %v377_v17 = vadd.f32 1e-05, %v373_v16 }
 0x35c   :  { %693 = vrsqrt.f32 %v377_v17 }
 0x364   :  { %v692_v19 = vpop.eup %691 }
 0x365   :  { %v380_v21 = vmul.f32 %v692_v19, %v374_v18 }
 0x366   :  { %v694_v22 = vpop.eup %693 }
 0x367   :  { %v381_v24 = vmul.f32 %v694_v22, %v375_v20  ;;  %v388_v25 = vmul.f32 %v553_v0, %v380_v21 }
 0x369   :  { %v389_v26 = vmul.f32 %v553_v0, %v381_v24  ;;  %v396_v27 = vadd.f32 %v554_v23, %v388_v25 }
 0x36b   :  { %v397_v28 = vadd.f32 %v554_v23, %v389_v26  ;;  %v398_v29 = vmax.f32 %v396_v27, 0.0 }
 0x36d   :  { %v399_v30 = vmax.f32 %v397_v28, 0.0 }
 0x36f   :  { %v400_v31 = vpack.c.bf16 %v399_v30, %v398_v29 }
 0x371   :  { %648 = vmatmul.mubr.bf16.vlgmr.msra.gmra.mrb[4].mxu0 %v400_v31 }
 0x444   :  { %v506_v33 = vpop.f32.mrb[4].mxu0 }
 0x445   :  { %v507_v34 = vadd.f32 %v555_v32, %v506_v33  ;;  %v649_v35 = vpop.f32.mrb[5].mxu0 }
 0x446   :  { %v509_v36 = vpop.f32.mrb[6].mxu0 }
 0x447   :  { %513 = vst [vmem:[#allocation10] sm:$0xff] %v507_v34  ;;  %v510_v37 = vadd.f32 %v555_v32, %v509_v36  ;;  %v650_v38 = vpop.f32.mrb[7].mxu0 }
 0x449   :  { %514 = vst [vmem:[#allocation10 + $0x8] sm:$0xff] %v510_v37 }
 0x44a   :  { %794 = shalt.err (!%p791_p8)
}
 0x44b   :  { %s795_s25 = scalar_lea.hbm %s1014_s9, 256 }
 0x44c   :  { %p796_p9 = scmp.ne.s32.totalorder %s1014_s9, %s795_s25  ;;  %p799_p10 = scmp.lt.u32.totalorder %s795_s25, %s1014_s9 }
 0x44e   :  { %p801_p11 = pnand %p799_p10, %p796_p9 }
 0x450   :  { %804 = shalt.err (!%p801_p11)
}
 0x451   :  { %s822_s28 = smov 128   ;;  %s823_s29 = smov 8  }
 0x452   :  { %526 = dma.vmem_to_hbm [thread:$0]  %s521_s23, 256, %s1014_s9, [#allocation4], %s822_s28, %s822_s28, %s823_s29  }
 0x453   :  { %811 = dma.done.wait [#allocation4], 256  }
 0x454   :  { %812 = vsyncadd [#allocation4], 4294967040 }
 0x455   :  { %530 = vsyncpa [#allocation3], 1 }
 0x456   :  { %531 = vsyncpa [#allocation6], 1 }
 0x457   :  { %532 = vsyncpa [#allocation9], 1 }
 0x458   :  { %533 = vsyncpa [#allocation4], 1 }

</bundles_post_ra>
